<compile_context>
chip_gen: v5e
topology: v5e:2x2
jax: 0.10.0
libtpu: 0.0.40
codegen_flags: <defaults>
</compile_context>

<pallas_src>
import functools

import jax
import jax.numpy as jnp
from jax.experimental import pallas as pl
from jax.experimental.pallas import tpu as pltpu


def _round_up(x, m):
    return ((x + m - 1) // m) * m


def _sublane_tile(itemsize):
    # Physical vreg tile is (8, 128) x 32-bit; sub-32-bit dtypes pack along sublanes.
    return max(8, 32 // max(int(itemsize), 1))


def _phys_tile_bytes_2d(rows, cols, itemsize):
    """Physical (sublane/lane padded) VMEM footprint of a [rows, cols] block."""
    sub = _sublane_tile(itemsize)
    return _round_up(int(rows), sub) * _round_up(int(cols), 128) * int(itemsize)


def _head_kernel(x_ref, w1_ref, b1_ref, w2_ref, b2_ref,
                 logits_ref, probs_ref, acc_ref, *,
                 pooling, hw_total, block_hw, needs_mask):
    """x_ref: [TB, C, THW] tile of the [B, C, H*W] feature map (spatial on lanes)."""
    s = pl.program_id(1)
    n_s = pl.num_programs(1)

    @pl.when(s == 0)
    def _():
        if pooling == "max":
            acc_ref[...] = jnp.full(acc_ref.shape, -jnp.inf, acc_ref.dtype)
        else:
            acc_ref[...] = jnp.zeros(acc_ref.shape, acc_ref.dtype)

    def _reduce_tile(mask_tail):
        x = x_ref[...]                                    # [TB, C, THW], native dtype
        if pooling != "max":
            # avg: accumulate in f32 (summing many low-precision values loses bits)
            x = x.astype(jnp.float32)
        if mask_tail:
            # [1, 1, THW] iota/compare broadcast — no full-size int32 index tensor.
            pos = jax.lax.broadcasted_iota(jnp.int32, (1, 1, x.shape[-1]), 2)
            valid = (pos + s * block_hw) < hw_total
            pad = -jnp.inf if pooling == "max" else 0.0
            x = jnp.where(valid, x, jnp.asarray(pad, dtype=x.dtype))
        if pooling == "max":
            # max is exact in the native dtype; cast only the small [TB, C] result.
            red = jnp.max(x, axis=-1).astype(jnp.float32)
            acc_ref[...] = jnp.maximum(acc_ref[...], red)
        else:
            acc_ref[...] = acc_ref[...] + jnp.sum(x, axis=-1)

    if needs_mask:
        # Only the last (partial) spatial tile pays for the padded-row mask.
        @pl.when(s < n_s - 1)
        def _():
            _reduce_tile(False)

        @pl.when(s == n_s - 1)
        def _():
            _reduce_tile(True)
    else:
        _reduce_tile(False)

    # One-shot epilogue: ClassifierFCN (1x1 convs == linears; Dropout = identity
    # in eval mode) followed by softmax over classes.
    @pl.when(s == n_s - 1)
    def _():
        pooled = acc_ref[...]                             # [TB, C] f32
        if pooling == "avg":
            pooled = pooled * jnp.float32(1.0 / hw_total)
        h = jnp.dot(pooled, w1_ref[...].astype(jnp.float32),
                    preferred_element_type=jnp.float32)
        h = jnp.maximum(h + b1_ref[...].astype(jnp.float32), 0.0)
        logits = jnp.dot(h, w2_ref[...].astype(jnp.float32),
                         preferred_element_type=jnp.float32)
        logits = logits + b2_ref[...].astype(jnp.float32)
        m = jnp.max(logits, axis=-1, keepdims=True)
        e = jnp.exp(logits - m)
        denom = jnp.sum(e, axis=-1, keepdims=True)
        probs = e * pl.reciprocal(denom, approx=False)    # exact, matches reference
        logits_ref[...] = logits.astype(logits_ref.dtype)
        probs_ref[...] = probs.astype(probs_ref.dtype)


def _pick_batch_tile(B):
    if B <= 8:
        return B
    if B % 8 != 0:
        # Single full-batch block — never silently drop tail rows.
        return B
    # Largest multiple-of-8 divisor of B, capped at 64, leaving >= 2 blocks so
    # the "parallel" batch axis gives v7x's 2nd TensorCore work (free on v5e/v6e).
    best = 8
    for tb in range(8, min(B // 2, 64) + 1, 8):
        if B % tb == 0:
            best = tb
    return best


def _pick_spatial_tile(hw, tb, c, itemsize, vmem_cap):
    if hw <= 128:
        return hw
    # Physical footprint: C rounds up to the sublane tile, spatial lane dim is a
    # multiple of 128.  One pipeline buffer gets ~1/8 of VMEM (x stream ~1/4 with
    # double buffering) so v7x's 64 MiB automatically halves the tile vs 128 MiB.
    c_pad = _round_up(int(c), _sublane_tile(itemsize))
    budget = vmem_cap // 8
    thw = budget // max(tb * c_pad * int(itemsize), 1)
    thw = (min(thw, hw) // 128) * 128
    thw = max(thw, 128)
    return hw if thw >= hw else thw


def head_global_pooling_classifier(x_nchw, w1, b1, w2, b2, *,
                                   pooling="max", block_hw=None):
    """Forward pass of HeadGlobalPoolingClassifier (single 4-D conv_input).

    x_nchw: [B, C, H, W] feature map (PyTorch NCHW layout). No wrapper transpose:
            it is reshaped (free) to [B, C, H*W] and pooling reduces the lane axis
            inside the kernel.
    w1: [C, hidden]  b1: [hidden]   (ClassifierFCN first 1x1 conv, transposed)
    w2: [hidden, NC] b2: [NC]       (ClassifierFCN last 1x1 conv, transposed)
    Returns (logits, probs) == ('model.logits.head', 'model.output.head').
    """
    assert pooling in ("max", "avg")
    B, C, H, W = x_nchw.shape
    HW = H * W
    x = x_nchw.reshape(B, C, HW)           # free reshape — no extra HBM pass

    hidden = w1.shape[1]
    num_classes = w2.shape[1]
    assert w1.shape[0] == C and w2.shape[0] == hidden

    try:
        vmem_cap = int(pltpu.get_tpu_info().vmem_capacity_bytes)
    except Exception:
        vmem_cap = 128 * 1024 * 1024

    itemsize = jnp.dtype(x.dtype).itemsize
    TB = _pick_batch_tile(B)
    if block_hw is None:
        THW = _pick_spatial_tile(HW, TB, C, itemsize, vmem_cap)
    else:
        THW = min(int(block_hw), HW)
        assert THW == HW or THW % 128 == 0, \
            "block_hw must be a multiple of 128 (lane dim) or cover all of H*W"
    n_b = B // TB
    n_s = pl.cdiv(HW, THW)
    needs_mask = (HW % THW) != 0

    b1_2d = b1.reshape(1, hidden)
    b2_2d = b2.reshape(1, num_classes)

    kernel = functools.partial(_head_kernel, pooling=pooling, hw_total=HW,
                               block_hw=THW, needs_mask=needs_mask)

    # VMEM budget from *physical* (lane/sublane padded) block sizes.
    x_block_bytes = TB * _phys_tile_bytes_2d(C, THW, itemsize)
    weight_bytes = (
        _phys_tile_bytes_2d(C, hidden, jnp.dtype(w1.dtype).itemsize)
        + _phys_tile_bytes_2d(1, hidden, jnp.dtype(b1_2d.dtype).itemsize)
        + _phys_tile_bytes_2d(hidden, num_classes, jnp.dtype(w2.dtype).itemsize)
        + _phys_tile_bytes_2d(1, num_classes, jnp.dtype(b2_2d.dtype).itemsize))
    out_block_bytes = 2 * _phys_tile_bytes_2d(TB, num_classes, 4)
    acc_bytes = _phys_tile_bytes_2d(TB, C, 4)
    vmem_limit = (2 * x_block_bytes + 2 * weight_bytes + 2 * out_block_bytes
                  + acc_bytes + (2 << 20))
    vmem_limit = int(min(max(vmem_limit, 16 << 20), int(vmem_cap * 0.9)))

    cost = pl.CostEstimate(
        flops=int(B * HW * C + 2 * B * C * hidden
                  + 2 * B * hidden * num_classes),
        transcendentals=int(B * num_classes),
        bytes_accessed=int(x.size * itemsize
                           + w1.size * jnp.dtype(w1.dtype).itemsize
                           + w2.size * jnp.dtype(w2.dtype).itemsize
                           + 2 * B * num_classes * 4),
    )

    grid_spec = pltpu.PrefetchScalarGridSpec(
        num_scalar_prefetch=0,
        grid=(n_b, n_s),                                # reduction (spatial) axis last
        in_specs=[
            pl.BlockSpec((TB, C, THW), lambda b, s: (b, 0, s)),
            pl.BlockSpec((C, hidden), lambda b, s: (0, 0)),
            pl.BlockSpec((1, hidden), lambda b, s: (0, 0)),
            pl.BlockSpec((hidden, num_classes), lambda b, s: (0, 0)),
            pl.BlockSpec((1, num_classes), lambda b, s: (0, 0)),
        ],
        out_specs=(
            pl.BlockSpec((TB, num_classes), lambda b, s: (b, 0)),
            pl.BlockSpec((TB, num_classes), lambda b, s: (b, 0)),
        ),
        scratch_shapes=[pltpu.VMEM((TB, C), jnp.float32)],   # running max / sum
    )

    logits, probs = pl.pallas_call(
        kernel,
        out_shape=(
            jax.ShapeDtypeStruct((B, num_classes), jnp.float32),  # model.logits.head
            jax.ShapeDtypeStruct((B, num_classes), jnp.float32),  # model.output.head
        ),
        grid_spec=grid_spec,
        compiler_params=pltpu.CompilerParams(
            dimension_semantics=("parallel", "arbitrary"),
            vmem_limit_bytes=vmem_limit,
        ),
        cost_estimate=cost,
    )(x, w1, b1_2d, w2, b2_2d)
    return logits, probs


def _reference(x_nchw, w1, b1, w2, b2, pooling="max"):
    if pooling == "max":
        pooled = jnp.max(x_nchw, axis=(2, 3))
    else:
        pooled = jnp.mean(x_nchw, axis=(2, 3))
    h = jnp.maximum(pooled @ w1 + b1, 0.0)
    logits = h @ w2 + b2
    return logits, jax.nn.softmax(logits, axis=1)


if __name__ == "__main__":
    # Module config: conv_inputs=(('model.backbone_features', 4),), num_classes=2,
    # pooling in {'max','avg'}, layers_description=(32,), dropout_rate=0.1 (eval).
    B, C, H, W = 2, 4, 16, 16
    hidden, num_classes = 32, 2

    key = jax.random.PRNGKey(0)
    kx, k1, k2, k3, k4 = jax.random.split(key, 5)

    x = jax.random.normal(kx, (B, C, H, W), dtype=jnp.float32)

    # Conv2d-style uniform(-1/sqrt(fan_in), 1/sqrt(fan_in)) init.
    lim1 = 1.0 / jnp.sqrt(jnp.float32(C))
    w1 = jax.random.uniform(k1, (C, hidden), jnp.float32, -lim1, lim1)
    b1 = jax.random.uniform(k2, (hidden,), jnp.float32, -lim1, lim1)
    lim2 = 1.0 / jnp.sqrt(jnp.float32(hidden))
    w2 = jax.random.uniform(k3, (hidden, num_classes), jnp.float32, -lim2, lim2)
    b2 = jax.random.uniform(k4, (num_classes,), jnp.float32, -lim2, lim2)

    # 1) max pooling with a forced 128-lane spatial tile (256 = 128 + 128) to
    #    exercise the running-max accumulator across spatial grid steps.
    logits, probs = head_global_pooling_classifier(
        x, w1, b1, w2, b2, pooling="max", block_hw=128)
    jax.block_until_ready((logits, probs))
    ref_logits, ref_probs = _reference(x, w1, b1, w2, b2, "max")
    assert logits.shape == (B, num_classes) and probs.shape == (B, num_classes)
    assert jnp.allclose(logits, ref_logits, atol=1e-4, rtol=1e-4)
    assert jnp.allclose(probs, ref_probs, atol=1e-4, rtol=1e-4)

    # 2) avg pooling with auto tile selection (single full-extent spatial tile).
    logits_a, probs_a = head_global_pooling_classifier(
        x, w1, b1, w2, b2, pooling="avg")
    jax.block_until_ready((logits_a, probs_a))
    ref_logits_a, ref_probs_a = _reference(x, w1, b1, w2, b2, "avg")
    assert jnp.allclose(logits_a, ref_logits_a, atol=1e-4, rtol=1e-4)
    assert jnp.allclose(probs_a, ref_probs_a, atol=1e-4, rtol=1e-4)

    # 3) odd spatial extent (H*W = 240, tile 128) to exercise the gated
    #    padded-row mask on the final partial spatial tile for both poolings.
    x_odd = jax.random.normal(jax.random.PRNGKey(1), (B, C, 15, 16),
                              dtype=jnp.float32)
    for pool in ("max", "avg"):
        lo, po = head_global_pooling_classifier(
            x_odd, w1, b1, w2, b2, pooling=pool, block_hw=128)
        jax.block_until_ready((lo, po))
        rlo, rpo = _reference(x_odd, w1, b1, w2, b2, pool)
        assert jnp.allclose(lo, rlo, atol=1e-4, rtol=1e-4)
        assert jnp.allclose(po, rpo, atol=1e-4, rtol=1e-4)

    print("KERNEL_OK")
</pallas_src>

<mosaic_0001>
module attributes {stable_mosaic.version = 11 : i64} {
  func.func @_head_kernel(%arg0: i32, %arg1: i32, %arg2: memref<2x4x128xf32, #tpu.memory_space<vmem>>, %arg3: memref<4x32xf32, #tpu.memory_space<vmem>>, %arg4: memref<1x32xf32, #tpu.memory_space<vmem>>, %arg5: memref<32x2xf32, #tpu.memory_space<vmem>>, %arg6: memref<1x2xf32, #tpu.memory_space<vmem>>, %arg7: memref<2x2xf32, #tpu.memory_space<vmem>>, %arg8: memref<2x2xf32, #tpu.memory_space<vmem>>, %arg9: memref<2x4xf32, #tpu.memory_space<vmem>>) attributes {dimension_semantics = [#tpu.dimension_semantics<parallel>, #tpu.dimension_semantics<arbitrary>], iteration_bounds = array<i64: 1, 2>, scalar_prefetch = 0 : i64, scratch_operands = 1 : i64, tpu.core_type = #tpu.core_type<tc>, window_params = [{transform_indices = @transform_0, window_bounds = array<i64: 2, 4, 128>}, {pipeline_mode = #tpu.pipeline_mode<synchronous>, transform_indices = @transform_1, window_bounds = array<i64: 4, 32>}, {pipeline_mode = #tpu.pipeline_mode<synchronous>, transform_indices = @transform_2, window_bounds = array<i64: 1, 32>}, {pipeline_mode = #tpu.pipeline_mode<synchronous>, transform_indices = @transform_3, window_bounds = array<i64: 32, 2>}, {pipeline_mode = #tpu.pipeline_mode<synchronous>, transform_indices = @transform_4, window_bounds = array<i64: 1, 2>}, {transform_indices = @transform_5, window_bounds = array<i64: 2, 2>}, {transform_indices = @transform_6, window_bounds = array<i64: 2, 2>}]} {
    %c0_i32 = arith.constant 0 : i32
    %0 = arith.cmpi eq, %arg1, %c0_i32 : i32
    %1 = arith.extui %0 : i1 to i32
    %c0_i32_0 = arith.constant 0 : i32
    %2 = arith.cmpi ne, %1, %c0_i32_0 : i32
    scf.if %2 {
      %cst_8 = arith.constant 0xFF800000 : f32
      %11 = vector.broadcast %cst_8 : f32 to vector<2x4xf32>
      %c0_9 = arith.constant 0 : index
      %c0_10 = arith.constant 0 : index
      %12 = vector.load %arg9[%c0_9, %c0_10] : memref<2x4xf32, #tpu.memory_space<vmem>>, vector<2x4xf32>
      tpu.vector_store %arg9[%c0_9, %c0_10], %11 {strides = array<i32>} : memref<2x4xf32, #tpu.memory_space<vmem>>, vector<2x4xf32>,
    } else {
    }
    %c0 = arith.constant 0 : index
    %c0_1 = arith.constant 0 : index
    %c0_2 = arith.constant 0 : index
    %3 = vector.load %arg2[%c0, %c0_1, %c0_2] : memref<2x4x128xf32, #tpu.memory_space<vmem>>, vector<2x4x128xf32>
    %cst = arith.constant dense<0xFF800000> : vector<2x4xf32>
    %4 = vector.multi_reduction <maximumf>, %3, %cst [2] : vector<2x4x128xf32> to vector<2x4xf32>
    %c0_3 = arith.constant 0 : index
    %c0_4 = arith.constant 0 : index
    %5 = vector.load %arg9[%c0_3, %c0_4] : memref<2x4xf32, #tpu.memory_space<vmem>>, vector<2x4xf32>
    %6 = arith.maximumf %5, %4 : vector<2x4xf32>
    %c0_5 = arith.constant 0 : index
    %c0_6 = arith.constant 0 : index
    %7 = vector.load %arg9[%c0_5, %c0_6] : memref<2x4xf32, #tpu.memory_space<vmem>>, vector<2x4xf32>
    tpu.vector_store %arg9[%c0_5, %c0_6], %6 {strides = array<i32>} : memref<2x4xf32, #tpu.memory_space<vmem>>, vector<2x4xf32>,
    %c1_i32 = arith.constant 1 : i32
    %8 = arith.cmpi eq, %arg1, %c1_i32 : i32
    %9 = arith.extui %8 : i1 to i32
    %c0_i32_7 = arith.constant 0 : i32
    %10 = arith.cmpi ne, %9, %c0_i32_7 : i32
    scf.if %10 {
      %c0_8 = arith.constant 0 : index
      %c0_9 = arith.constant 0 : index
      %11 = vector.load %arg9[%c0_8, %c0_9] : memref<2x4xf32, #tpu.memory_space<vmem>>, vector<2x4xf32>
      %c0_10 = arith.constant 0 : index
      %c0_11 = arith.constant 0 : index
      %12 = vector.load %arg3[%c0_10, %c0_11] : memref<4x32xf32, #tpu.memory_space<vmem>>, vector<4x32xf32>
      %cst_12 = arith.constant dense<0.000000e+00> : vector<2x32xf32>
      %13 = tpu.matmul %11, %12, %cst_12 {dimension_numbers = #tpu.dot_dimension_numbers<[1], [0], [0], [1], [0, 0, 1, 1], [], []>} : vector<2x4xf32>, vector<4x32xf32>, vector<2x32xf32> -> vector<2x32xf32>
      %c0_13 = arith.constant 0 : index
      %c0_14 = arith.constant 0 : index
      %14 = vector.load %arg4[%c0_13, %c0_14] : memref<1x32xf32, #tpu.memory_space<vmem>>, vector<1x32xf32>
      %15 = vector.broadcast %14 : vector<1x32xf32> to vector<2x32xf32>
      %16 = arith.addf %13, %15 : vector<2x32xf32>
      %cst_15 = arith.constant 0.000000e+00 : f32
      %17 = vector.broadcast %cst_15 : f32 to vector<2x32xf32>
      %18 = arith.maximumf %16, %17 : vector<2x32xf32>
      %c0_16 = arith.constant 0 : index
      %c0_17 = arith.constant 0 : index
      %19 = vector.load %arg5[%c0_16, %c0_17] : memref<32x2xf32, #tpu.memory_space<vmem>>, vector<32x2xf32>
      %cst_18 = arith.constant dense<0.000000e+00> : vector<2x2xf32>
      %20 = tpu.matmul %18, %19, %cst_18 {dimension_numbers = #tpu.dot_dimension_numbers<[1], [0], [0], [1], [0, 0, 1, 1], [], []>} : vector<2x32xf32>, vector<32x2xf32>, vector<2x2xf32> -> vector<2x2xf32>
      %c0_19 = arith.constant 0 : index
      %c0_20 = arith.constant 0 : index
      %21 = vector.load %arg6[%c0_19, %c0_20] : memref<1x2xf32, #tpu.memory_space<vmem>>, vector<1x2xf32>
      %22 = vector.broadcast %21 : vector<1x2xf32> to vector<2x2xf32>
      %23 = arith.addf %20, %22 : vector<2x2xf32>
      %cst_21 = arith.constant dense<0xFF800000> : vector<2xf32>
      %24 = vector.multi_reduction <maximumf>, %23, %cst_21 [1] : vector<2x2xf32> to vector<2xf32>
      %25 = vector.shape_cast %24 : vector<2xf32> to vector<2x1xf32>
      %26 = vector.broadcast %25 : vector<2x1xf32> to vector<2x2xf32>
      %27 = arith.subf %23, %26 : vector<2x2xf32>
      %28 = math.exp %27 : vector<2x2xf32>
      %cst_22 = arith.constant dense<0.000000e+00> : vector<2xf32>
      %29 = vector.multi_reduction <add>, %28, %cst_22 [1] : vector<2x2xf32> to vector<2xf32>
      %30 = vector.shape_cast %29 : vector<2xf32> to vector<2x1xf32>
      %31 = tpu.reciprocal %30 : vector<2x1xf32> -> vector<2x1xf32>
      %32 = vector.broadcast %31 : vector<2x1xf32> to vector<2x2xf32>
      %33 = arith.mulf %28, %32 : vector<2x2xf32>
      %c0_23 = arith.constant 0 : index
      %c0_24 = arith.constant 0 : index
      %34 = vector.load %arg7[%c0_23, %c0_24] : memref<2x2xf32, #tpu.memory_space<vmem>>, vector<2x2xf32>
      tpu.vector_store %arg7[%c0_23, %c0_24], %23 {strides = array<i32>} : memref<2x2xf32, #tpu.memory_space<vmem>>, vector<2x2xf32>,
      %c0_25 = arith.constant 0 : index
      %c0_26 = arith.constant 0 : index
      %35 = vector.load %arg8[%c0_25, %c0_26] : memref<2x2xf32, #tpu.memory_space<vmem>>, vector<2x2xf32>
      tpu.vector_store %arg8[%c0_25, %c0_26], %33 {strides = array<i32>} : memref<2x2xf32, #tpu.memory_space<vmem>>, vector<2x2xf32>,
    } else {
    }
    return
  }
  func.func @transform_0(%arg0: i32, %arg1: i32) -> (i32, i32, i32) {
    %c0_i32 = arith.constant 0 : i32
    %c0_i32_0 = arith.constant 0 : i32
    return %arg0, %c0_i32, %arg1 : i32, i32, i32
  }
  func.func @transform_1(%arg0: i32, %arg1: i32) -> (i32, i32) {
    %c0_i32 = arith.constant 0 : i32
    %c0_i32_0 = arith.constant 0 : i32
    %c0_i32_1 = arith.constant 0 : i32
    return %c0_i32, %c0_i32_0 : i32, i32
  }
  func.func @transform_2(%arg0: i32, %arg1: i32) -> (i32, i32) {
    %c0_i32 = arith.constant 0 : i32
    %c0_i32_0 = arith.constant 0 : i32
    %c0_i32_1 = arith.constant 0 : i32
    return %c0_i32, %c0_i32_0 : i32, i32
  }
  func.func @transform_3(%arg0: i32, %arg1: i32) -> (i32, i32) {
    %c0_i32 = arith.constant 0 : i32
    %c0_i32_0 = arith.constant 0 : i32
    %c0_i32_1 = arith.constant 0 : i32
    return %c0_i32, %c0_i32_0 : i32, i32
  }
  func.func @transform_4(%arg0: i32, %arg1: i32) -> (i32, i32) {
    %c0_i32 = arith.constant 0 : i32
    %c0_i32_0 = arith.constant 0 : i32
    %c0_i32_1 = arith.constant 0 : i32
    return %c0_i32, %c0_i32_0 : i32, i32
  }
  func.func @transform_5(%arg0: i32, %arg1: i32) -> (i32, i32) {
    %c0_i32 = arith.constant 0 : i32
    %c0_i32_0 = arith.constant 0 : i32
    return %arg0, %c0_i32 : i32, i32
  }
  func.func @transform_6(%arg0: i32, %arg1: i32) -> (i32, i32) {
    %c0_i32 = arith.constant 0 : i32
    %c0_i32_0 = arith.constant 0 : i32
    return %arg0, %c0_i32 : i32, i32
  }
}

</mosaic_0001>

<bundles_post_ra>
// kernel: tpu_custom_call.1
= control target key start
LH: loop header
LB: loop body
LE: loop exit
PB: predicated region body
PF: predicated region fallthrough
CT: control target
= control target key end

     0   :  { %12 = vsyncpa [#allocation5], 0  ;;  %s871_s0 = inlined_call_operand.vmem [shape: f32[2,4,256], index: 0, kind: input, shape index: {}]   ;;  %s872_s1 = inlined_call_operand.vmem [shape: f32[4,32], index: 1, kind: input, shape index: {}]   ;;  %s873_s2 = inlined_call_operand.vmem [shape: f32[1,32], index: 2, kind: input, shape index: {}]   ;;  %s874_s3 = inlined_call_operand.vmem [shape: f32[32,2], index: 3, kind: input, shape index: {}]   ;;  %s875_s4 = inlined_call_operand.vmem [shape: f32[1,2], index: 4, kind: input, shape index: {}]   ;;  %s876_s5 = inlined_call_operand.hbm [shape: f32[2,2], index: 5, kind: output, shape index: {0}]   ;;  %s877_s6 = inlined_call_operand.hbm [shape: f32[2,2], index: 6, kind: output, shape index: {1}]  }
   0x1   :  { %13 = vsyncpa [#allocation7], 0  ;;  %s755_s21 = smov 0   ;;  %s757_s22 = smov 0  }
   0x2   :  { %s759_s23 = smov 0   ;;  %s761_s24 = smov 0  }
   0x3   :  { %s763_s25 = smov 0  }
   0x4 LB: > { %s534_s26 = sadd.s32 4294967295, %s715_s25   ;;  %s28_s27 = sadd.s32 1, %s711_s24  ;;  %s715_s25 = sphi %s763_s25, %s19_s25   ;;  %s711_s24 = sphi %s761_s24, %s882_s24   ;;  %s707_s23 = sphi %s759_s23, %s881_s23   ;;  %s703_s22 = sphi %s757_s22, %s880_s22   ;;  %s699_s21 = sphi %s755_s21, %s879_s21  }
   0x5   : > { %p29_p0 = scmp.ge.s32.totalorder %s28_s27, 2  ;;  %p47_p1 = scmp.ne.s32.totalorder %s703_s22, %s699_s21 }
   0x6   : > { %p48_p2 = scmp.eq.s32.totalorder %s715_s25, 0  ;;  %s40_s29 = sadd.s32 1, %s703_s22 }
   0x7   : > { %s884_s27 = smov (%p29_p0, %s28_s27), 0  ;;  %p536_p5 = scmp.ge.s32.totalorder %s715_s25, 2 }
   0x8   : > { %p49_p3 = por %p48_p2, %p47_p1  ;;  %s36_s28 = ssub.s32 %s711_s24, %s884_s27 }
   0x9   : > { %p38_p4 = scmp.eq.s32.totalorder %s36_s28, 0  ;;  %221 = sbr.rel (%p536_p5) target bundleno = 20 (0x14), region = 32 }
   0xb   : > { %s791_s30 = scalar_select %p38_p4, %s703_s22, %s40_s29  }
   0xe   : > { %224 = sbr.rel (!%p49_p3) target bundleno = 20 (0x14), region = 36  ;;  %s226_s7 = sand.u32 (%p49_p3), 1, %s703_s22  }
   0xf   : > { %s538_s8 = sshll.u32 (%p49_p3), %s711_s24, 2  ;;  %s537_s9 = sshll.u32 (%p49_p3), %s226_s7, 3 }
  0x10   : > { %s233_s12 = scalar_lea.vmem (%p49_p3), %s871_s0, %s538_s8  ;;  %s228_s13 = scalar_lea.vmem (%p49_p3), [#allocation3], %s537_s9 }
  0x11   : > { %v250_v0 = vld [vmem:[%s233_s12] sm:$0xf] (%p49_p3)  ;;  %v252_v1 = vld [vmem:[%s233_s12 + $0x8] sm:$0xf] (%p49_p3) }
  0x12   : > { %251 = vst [vmem:[%s228_s13] sm:$0xf] (%p49_p3), %v250_v0 }
  0x13   : > { %253 = vst [vmem:[%s228_s13 + $0x4] sm:$0xf] %v252_v1 }
  0x14 PF: > { %p539_p6 = scmp.ge.s32.totalorder %s715_s25, 1  ;;  %p280_p7 = scmp.lt.s32.totalorder %s715_s25, 3 }
  0x16   : > { %p281_p8 = pnand %p539_p6, %p280_p7 }
  0x17   : > { %s287_s14 = sand.u32 (!%p281_p8), 1, %s699_s21   ;;  %p541_p9 = scmp.ne.s32.totalorder (!%p281_p8), %s707_s23, 0 }
  0x18   : > { %284 = sbr.rel (%p281_p8) target bundleno = 708 (0x2c4), region = 77  ;;  %s540_s15 = sshll.u32 (!%p281_p8), %s287_s14, 3 }
  0x19   : > { %s289_s16 = scalar_lea.vmem (!%p281_p8), [#allocation3], %s540_s15 }
  0x1d   : > { %315 = sbr.rel (%p541_p9) target bundleno = 36 (0x24), region = 85 }
  0x22   : > { %vm316_vm0 = vcmask 25600   ;;  %v717_v2 = vmov -inf  }
  0x23   : > { %317 = vst.msk [vmem:[#allocation2] sm:$0x3] %vm316_vm0, %v717_v2 }
  0x24 PF: > { %v318_v3 = vld [vmem:[%s289_s16] sm:$0xf]  ;;  %vm320_vm1 = vcmask 1043456   ;;  %v319_v5 = vld [vmem:[%s289_s16 + $0x4] sm:$0xf]  ;;  %v330_v8 = vlaneseq  ;;  %vm334_vm2 = vcmask 1041409  }
  0x25   : > { %v321_v4 = vsel %vm320_vm1, %v318_v3, -inf  ;;  %v324_v6 = vsel %vm320_vm1, %v319_v5, -inf  ;;  %vm338_vm3 = vcmask 25600   ;;  %p542_p10 = scmp.ne.s32.totalorder %s707_s23, 1 }
  0x26   : > { %322 = vmax.xlane.f32.xlu0 %v321_v4  ;;  %v331_v9 = vand.u32 127, %v330_v8 }
  0x2a   : > { %v327_v12 = vld [vmem:[#allocation2] sm:$0x3] }
  0x2e   : > { %325 = vmax.xlane.f32.xlu0 %v324_v6 }
  0x99   : > { %v323_v7 = vpop.xlane.xlu0 %322 }
  0x9a   : > { %v332_v11 = vperm.slane %v323_v7, %v331_v9 }
  0xa1   : > { %v326_v10 = vpop.xlane.xlu0 %325 }
  0xa2   : > { %v333_v13 = vperm.slane %v326_v10, %v331_v9 }
  0xa3   : > { %343 = sbr.rel (%p542_p10) target bundleno = 698 (0x2ba), region = 89 }
  0xa4   : > { %v335_v14 = vsel %vm334_vm2, %v333_v13, %v332_v11 }
  0xa5   : > { %v337_v15 = vmax.f32 %v327_v12, %v335_v14 }
  0xa7   : > { %339 = vst.msk [vmem:[#allocation2] sm:$0x3] %vm338_vm3, %v337_v15 }
  0xa8   : > { %v345_v16 = vld [vmem:[%s872_s1] sm:$0xf]  ;;  %vm350_vm4 = vcmask 31744   ;;  %v381_v18 = vld [vmem:[%s874_s3 + $0x18] sm:$0xff]  ;;  %v380_v19 = vld [vmem:[%s874_s3 + $0x10] sm:$0xff]  ;;  %vm386_vm5 = vcmask 261120  }
  0xa9   : > { %543 = vmatpush.msk.msra.mxu0 %vm320_vm1, %v345_v16  ;;  %402 = vmatpush.msra.mxu1 %v381_v18  ;;  %v379_v20 = vld [vmem:[%s874_s3 + $0x8] sm:$0xff]  ;;  %v378_v21 = vld [vmem:[%s874_s3] sm:$0xff]  ;;  %vm410_vm6 = vcmask 9216  }
  0xaa   : > { %v607_v22 = vld [vmem:[%s873_s2] ss:$0 sm:$0xff] }
  0xab   : > { %403 = vmatpush.msra.mxu1 %v380_v19  ;;  %v608_v26 = vld [vmem:[%s875_s4] ss:$0 sm:$0xff] }
  0xad   : > { %404 = vmatpush.msra.mxu1 %v379_v20 }
  0xae   : > { %v344_v17 = vld [vmem:[#allocation2] sm:$0x3] }
  0xaf   : > { %544 = vmatmul.msk.f32.vlgmr.msra.gmra.mxu0 %vm350_vm4, %v344_v17  ;;  %405 = vmatpush.msra.mxu1 %v378_v21 }
 0x12c   : > { %v374_v23 = vpop.f32.mrf.mxu0 }
 0x12d   : > { %v375_v24 = vadd.f32 %v607_v22, %v374_v23 }
 0x12f   : > { %v377_v25 = vmax.f32 %v375_v24, 0.0 }
 0x131   : > { %545 = vmatmul.msk.f32.vlgmr.msra.gmra.mxu1 %vm386_vm5, %v377_v25 }
 0x1ae   : > { %v407_v27 = vpop.f32.mrf.mxu1 }
 0x1af   : > { %v408_v28 = vadd.f32 %v608_v26, %v407_v27 }
 0x1b1   : > { %v411_v29 = vsel %vm410_vm6, %v408_v28, -inf  ;;  %435 = vst.msk [vmem:[#allocation4] sm:$0x3] %vm410_vm6, %v408_v28 }
 0x1b2   : > { %412 = vmax.xlane.f32.xlu0 %v411_v29 }
 0x225   : > { %v413_v30 = vpop.xlane.xlu0 %412 }
 0x226   : > { %v414_v31 = vsub.f32 %v408_v28, %v413_v30 }
 0x228   : > { %v415_v32 = vmul.f32 1.442695, %v414_v31 }
 0x22a   : > { %609 = vpow2.f32 %v415_v32 }
 0x230   : > { %v610_v33 = vpop.eup %609 }
 0x231   : > { %v417_v34 = vsel %vm410_vm6, %v610_v33, 0.0 }
 0x232   : > { %418 = vadd.xlane.f32.xlu0 %v417_v34 }
 0x2a5   : > { %v419_v35 = vpop.xlane.xlu0 %418 }
 0x2a6   : > { %611 = vrcp.f32 %v419_v35  ;;  %v431_v39 = vand.u32 2147483648, %v419_v35  ;;  %v429_v41 = vand.u32 2147483647, %v419_v35  ;;  %vm425_vm8 = vweird.f32 %v419_v35 }
 0x2a8   : > { %v432_v43 = vor.u32 1.1754944e-38, %v431_v39  ;;  %vm430_vm10 = vcmp.eq.f32.partialorder %v429_v41, 8.507059e+37 }
 0x2ac   : > { %v612_v36 = vpop.eup %611 }
 0x2ad   : > { %v421_v37 = vmul.f32 %v612_v36, %v419_v35  ;;  %vm426_vm7 = vweird.f32 %v612_v36 }
 0x2ae   : > { %vm427_vm9 = vmor %vm425_vm8, %vm426_vm7 }
 0x2af   : > { %v422_v38 = vsub.f32 1.0, %v421_v37 }
 0x2b1   : > { %v423_v40 = vmul.f32 %v612_v36, %v422_v38 }
 0x2b3   : > { %v424_v42 = vadd.f32 %v612_v36, %v423_v40 }
 0x2b5   : > { %v428_v44 = vsel %vm427_vm9, %v612_v36, %v424_v42 }
 0x2b6   : > { %v433_v45 = vsel %vm430_vm10, %v432_v43, %v428_v44 }
 0x2b7   : > { %v434_v46 = vmul.f32 %v610_v33, %v433_v45 }
 0x2b9   : > { %436 = vst.msk [vmem:[#allocation6] sm:$0x3] %vm410_vm6, %v434_v46 }
 0x2ba PF: > { %p834_p11 = scmp.eq.s32.totalorder %s534_s26, 1  ;;  %s447_s16 = sshll.u32 %s876_s5, 4  ;;  %s448_s16 = int_to_ptr.hbm [resolvable:$true] %s447_s16 }
 0x2bb   : > { %s718_s17 = smov [#allocation4]   ;;  %s719_s19 = smov [#allocation6]  }
 0x2bc   : > { %s445_s18 = sshll.u32 %s718_s17, 4  ;;  %s459_s20 = sshll.u32 %s719_s19, 4  ;;  %s446_s18 = int_to_ptr.vmem [resolvable:$true] %s445_s18  ;;  %s460_s20 = int_to_ptr.vmem [resolvable:$true] %s459_s20 }
 0x2bd   : > { %553 = dma.vmem_to_hbm [thread:$0]  (%p834_p11), %s446_s18, 32, %s448_s16, [#allocation5]  }
 0x2be   : > { %s461_s28 = sshll.u32 %s877_s6, 4  ;;  %s462_s28 = int_to_ptr.hbm [resolvable:$true] %s461_s28 }
 0x2bf   : > { %555 = dma.vmem_to_hbm [thread:$0]  (%p834_p11), %s460_s20, 32, %s462_s28, [#allocation7]  }
 0x2c0   : > { %690 = dma.done.wait (%p834_p11), [#allocation5], 32  }
 0x2c1   : > { %692 = vsyncadd (%p834_p11), [#allocation5], 4294967264 }
 0x2c2   : > { %694 = dma.done.wait (%p834_p11), [#allocation7], 32  }
 0x2c3   : > { %696 = vsyncadd (%p834_p11), [#allocation7], 4294967264 }
 0x2c4 PF: > { %s19_s25 = sadd.s32 1, %s715_s25   ;;  %s879_s21 = smov %s703_s22 }
 0x2c5   : > { %p16_p12 = scmp.ge.s32.totalorder %s19_s25, 4   ;;  %s880_s22 = smov %s791_s30 }
 0x2c6   : > { %s881_s23 = smov %s711_s24  ;;  %s882_s24 = smov %s884_s27 }
 0x2c7   :  { %18 = sbr.rel (!%p16_p12) target bundleno = 4 (0x4), region = 131 }
 0x2cc   :  { %480 = vsyncpa [#allocation5], 1 }
 0x2cd   :  { %482 = vsyncpa [#allocation5 + $0x1], 1 }
 0x2ce   :  { %483 = vsyncpa [#allocation7], 1 }

</bundles_post_ra>
